<compile_context>
chip_gen: v7x
topology: tpu7x:2x2x1
jax: 0.10.0
libtpu: 0.0.40
codegen_flags: <defaults>
</compile_context>

<pallas_src>
import functools

import jax
import jax.numpy as jnp
from jax import lax
from jax.experimental import pallas as pl
from jax.experimental.pallas import tpu as pltpu


def _tv_kernel(x_ref, out_ref, acc_h_ref, acc_w_ref, *,
               w, hw_valid, hw_pad, chunk, num_chunks, unroll):
    """Accumulate squared neighbor differences for one block of image planes.

    Block layout is (P, H*W): the flattened plane is the lane axis, so every
    vector op runs on dense 1024-element vregs.  Vertical neighbors are a
    lane roll by W, horizontal neighbors a lane roll by 1 (both XLU work),
    with column masks selecting the valid pairs.  Per-lane partials live in
    aligned (chunk, H*W) VMEM scratch; the cross-lane reduce to scalars runs
    once per slice in the final grid step.
    """
    j = pl.program_id(1)

    @pl.when(j == 0)
    def _init():
        acc_h_ref[...] = jnp.zeros_like(acc_h_ref)
        acc_w_ref[...] = jnp.zeros_like(acc_w_ref)

    # Column index over the flattened plane (hoisted out of the chunk loop).
    col = lax.broadcasted_iota(jnp.int32, (chunk, hw_pad), 1)
    if (w & (w - 1)) == 0:                 # power-of-two W: cheap bit-and
        col_in_row = col & (w - 1)
    else:
        col_in_row = col % w
    mask_w = col_in_row != 0               # pair (k-1, k) stays in one image row
    mask_h = col >= w                      # pair (k-W, k) needs image row >= 1
    if hw_pad != hw_valid:                 # static: zero-padded tail columns
        valid = col < hw_valid
        mask_w = jnp.logical_and(mask_w, valid)
        mask_h = jnp.logical_and(mask_h, valid)

    def _chunk(c, carry):
        start = pl.multiple_of(c * chunk, chunk)
        xs = x_ref[pl.ds(start, chunk), :].astype(jnp.float32)   # (chunk, hw)
        left = pltpu.roll(xs, shift=1, axis=1)                   # xs[:, k-1]
        up = pltpu.roll(xs, shift=w, axis=1)                     # xs[:, k-W]
        dw = jnp.where(mask_w, xs - left, 0.0)
        dh = jnp.where(mask_h, xs - up, 0.0)
        acc_h_ref[...] += dh * dh          # aligned, unmasked VPU accumulate
        acc_w_ref[...] += dw * dw
        return carry

    lax.fori_loop(0, num_chunks, _chunk, 0, unroll=unroll)

    @pl.when(j == pl.num_programs(1) - 1)
    def _finalize():
        out_ref[0, 0] = jnp.sum(acc_h_ref[...])   # unnormalized h_tv partial
        out_ref[0, 1] = jnp.sum(acc_w_ref[...])   # unnormalized w_tv partial


def tv_loss(x, tvloss_weight=1.0):
    """Total variation loss matching the PyTorch TVLoss.forward semantics.

    Args:
      x: (N, C, H, W) array (any float dtype; cast to f32 inside the kernel).
      tvloss_weight: scalar lambda (applied in the wrapper).

    Returns:
      scalar float32 loss.
    """
    n, c, h, w = x.shape
    count_h = float(c * (h - 1) * w)
    count_w = float(c * h * (w - 1))

    nc = n * c
    hw = h * w
    itemsize = jnp.dtype(x.dtype).itemsize

    # Free (copy-less, row-major) relayout: (N, C, H, W) -> (N*C, H*W).
    x2 = x.reshape(nc, hw)

    # Lane-pad the flattened plane to a multiple of 128 only when needed; the
    # extra zero columns are masked in-kernel.  Typical image sizes need no copy.
    hw_pad = ((hw + 127) // 128) * 128
    if hw_pad != hw:
        x2 = jnp.pad(x2, ((0, 0), (0, hw_pad - hw)))

    # Sublane-pad the plane count to a multiple of 8 only when needed.  Zero
    # planes contribute exactly 0 to both TV terms, so this is exact; unlike
    # padding to a block multiple it rarely triggers and adds <= 7 planes.
    nc_pad = ((nc + 7) // 8) * 8
    if nc_pad != nc:
        x2 = jnp.concatenate(
            [x2, jnp.zeros((nc_pad - nc, hw_pad), x2.dtype)], axis=0)

    # Planes per grid step: ~4 MiB DMA blocks (per-step ~0.35us overhead stays
    # <10% of HBM time on v6e/v7x), rounded to a multiple of 8 that divides
    # nc_pad so every block is full (no ragged tail, no padding copy).
    target_block_bytes = 4 * 1024 * 1024
    p_target = int(target_block_bytes // max(hw_pad * itemsize, 1))
    p_target = max(8, min(nc_pad, (p_target // 8) * 8))
    p = 8
    for cand in range(8, p_target + 1, 8):
        if nc_pad % cand == 0:
            p = cand
    # TODO(synk): planes whose (H*W) slab alone busts the VMEM budget (roughly
    # > 512x512 f32) need a flattened-plane tiling path with a W-column halo.

    # In-kernel plane chunk: bounds the f32 temporaries (cast/roll/square) to
    # a few hundred KiB regardless of the DMA block size (minimum 8 sublanes).
    max_chunk_elems = 32 * 1024
    chunk = 8
    for cand in range(8, p + 1, 8):
        if p % cand == 0 and cand * hw_pad <= max_chunk_elems:
            chunk = cand
    num_chunks = p // chunk
    unroll = num_chunks <= 8

    nb = nc_pad // p
    # Leading "parallel" axis lets v7x split plane blocks across its two
    # TensorCores; each slice owns its accumulators and output row, and the
    # partials are summed in the wrapper.  On v5e/v6e (one TC) it is a no-op.
    nsplit = 2 if (nb >= 2 and nb % 2 == 0) else 1
    nb_inner = nb // nsplit

    kernel = functools.partial(
        _tv_kernel, w=w, hw_valid=hw, hw_pad=hw_pad,
        chunk=chunk, num_chunks=num_chunks, unroll=unroll)

    partials = pl.pallas_call(
        kernel,
        out_shape=jax.ShapeDtypeStruct((nsplit, 2), jnp.float32),
        grid_spec=pltpu.PrefetchScalarGridSpec(
            num_scalar_prefetch=0,
            grid=(nsplit, nb_inner),
            in_specs=[
                pl.BlockSpec((p, hw_pad), lambda i, j: (i * nb_inner + j, 0)),
            ],
            out_specs=pl.BlockSpec(
                (1, 2), lambda i, j: (i, 0), memory_space=pltpu.SMEM),
            scratch_shapes=[
                pltpu.VMEM((chunk, hw_pad), jnp.float32),   # vertical partials
                pltpu.VMEM((chunk, hw_pad), jnp.float32),   # horizontal partials
            ],
        ),
        compiler_params=pltpu.CompilerParams(
            dimension_semantics=("parallel", "arbitrary"),
            vmem_limit_bytes=32 * 1024 * 1024,
        ),
    )(x2)

    h_tv = jnp.sum(partials[:, 0])
    w_tv = jnp.sum(partials[:, 1])
    return tvloss_weight * 2.0 * (h_tv / count_h + w_tv / count_w) / n


def tv_loss_ref(x, tvloss_weight=1.0):
    """Pure-JAX reference (mirrors the PyTorch forward exactly)."""
    n, c, h, w = x.shape
    count_h = c * (h - 1) * w
    count_w = c * h * (w - 1)
    h_tv = jnp.sum((x[:, :, 1:, :] - x[:, :, : h - 1, :]) ** 2)
    w_tv = jnp.sum((x[:, :, :, 1:] - x[:, :, :, : w - 1]) ** 2)
    return tvloss_weight * 2.0 * (h_tv / count_h + w_tv / count_w) / n


if __name__ == "__main__":
    key = jax.random.PRNGKey(0)
    # Small shapes consistent with an NCHW image tensor.
    x = jax.random.normal(key, (2, 4, 16, 16), dtype=jnp.float32)

    loss = tv_loss(x, tvloss_weight=1.0)
    loss = jax.block_until_ready(loss)

    ref = tv_loss_ref(x, tvloss_weight=1.0)
    assert jnp.allclose(loss, ref, rtol=1e-5, atol=1e-5), (loss, ref)

    print("KERNEL_OK")
</pallas_src>

<mosaic_0001>
module attributes {stable_mosaic.version = 11 : i64} {
  func.func @_tv_kernel(%arg0: i32, %arg1: i32, %arg2: memref<8x256xf32, #tpu.memory_space<vmem>>, %arg3: memref<1x2xf32, #tpu.memory_space<smem>>, %arg4: memref<8x256xf32, #tpu.memory_space<vmem>>, %arg5: memref<8x256xf32, #tpu.memory_space<vmem>>) attributes {dimension_semantics = [#tpu.dimension_semantics<parallel>, #tpu.dimension_semantics<arbitrary>], iteration_bounds = array<i64: 1, 1>, scalar_prefetch = 0 : i64, scratch_operands = 2 : i64, tpu.core_type = #tpu.core_type<tc>, window_params = [{transform_indices = @transform_0, window_bounds = array<i64: 8, 256>}, {transform_indices = @transform_1, window_bounds = array<i64: 1, 2>}]} {
    %c0_i32 = arith.constant 0 : i32
    %0 = arith.cmpi eq, %arg1, %c0_i32 : i32
    %1 = arith.extui %0 : i1 to i32
    %c0_i32_0 = arith.constant 0 : i32
    %2 = arith.cmpi ne, %1, %c0_i32_0 : i32
    scf.if %2 {
      %cst_16 = arith.constant 0.000000e+00 : f32
      %33 = vector.broadcast %cst_16 : f32 to vector<8x256xf32>
      %c0_17 = arith.constant 0 : index
      %c0_18 = arith.constant 0 : index
      %34 = vector.load %arg4[%c0_17, %c0_18] : memref<8x256xf32, #tpu.memory_space<vmem>>, vector<8x256xf32>
      tpu.vector_store %arg4[%c0_17, %c0_18], %33 {strides = array<i32>} : memref<8x256xf32, #tpu.memory_space<vmem>>, vector<8x256xf32>,
      %cst_19 = arith.constant 0.000000e+00 : f32
      %35 = vector.broadcast %cst_19 : f32 to vector<8x256xf32>
      %c0_20 = arith.constant 0 : index
      %c0_21 = arith.constant 0 : index
      %36 = vector.load %arg5[%c0_20, %c0_21] : memref<8x256xf32, #tpu.memory_space<vmem>>, vector<8x256xf32>
      tpu.vector_store %arg5[%c0_20, %c0_21], %35 {strides = array<i32>} : memref<8x256xf32, #tpu.memory_space<vmem>>, vector<8x256xf32>,
    } else {
    }
    %3 = tpu.iota {dimensions = array<i32: 1>} : vector<8x256xi32>
    %c15_i32 = arith.constant 15 : i32
    %4 = vector.broadcast %c15_i32 : i32 to vector<8x256xi32>
    %5 = arith.andi %3, %4 : vector<8x256xi32>
    %c0_i32_1 = arith.constant 0 : i32
    %6 = vector.broadcast %c0_i32_1 : i32 to vector<8x256xi32>
    %7 = arith.cmpi ne, %5, %6 : vector<8x256xi32>
    %c16_i32 = arith.constant 16 : i32
    %8 = vector.broadcast %c16_i32 : i32 to vector<8x256xi32>
    %9 = arith.cmpi sge, %3, %8 : vector<8x256xi32>
    %c0_i32_2 = arith.constant 0 : i32
    %c8_i32 = arith.constant 8 : i32
    %10 = arith.muli %c0_i32_2, %c8_i32 : i32
    %11 = tpu.assume_multiple %10, 8 : i32
    %12 = arith.index_cast %11 : i32 to index
    %c0 = arith.constant 0 : index
    %13 = vector.load %arg2[%12, %c0] : memref<8x256xf32, #tpu.memory_space<vmem>>, vector<8x256xf32>
    %c1_i32 = arith.constant 1 : i32
    %14 = tpu.dynamic_rotate %13 by %c1_i32 dim 1 : vector<8x256xf32>, i32 -> vector<8x256xf32>
    %c16_i32_3 = arith.constant 16 : i32
    %15 = tpu.dynamic_rotate %13 by %c16_i32_3 dim 1 : vector<8x256xf32>, i32 -> vector<8x256xf32>
    %16 = arith.subf %13, %14 : vector<8x256xf32>
    %cst = arith.constant 0.000000e+00 : f32
    %17 = vector.broadcast %cst : f32 to vector<8x256xf32>
    %18 = arith.select %7, %16, %17 : vector<8x256xi1>, vector<8x256xf32>
    %19 = arith.subf %13, %15 : vector<8x256xf32>
    %cst_4 = arith.constant 0.000000e+00 : f32
    %20 = vector.broadcast %cst_4 : f32 to vector<8x256xf32>
    %21 = arith.select %9, %19, %20 : vector<8x256xi1>, vector<8x256xf32>
    %c0_5 = arith.constant 0 : index
    %c0_6 = arith.constant 0 : index
    %22 = vector.load %arg4[%c0_5, %c0_6] : memref<8x256xf32, #tpu.memory_space<vmem>>, vector<8x256xf32>
    %23 = arith.mulf %21, %21 : vector<8x256xf32>
    %24 = arith.addf %22, %23 : vector<8x256xf32>
    %c0_7 = arith.constant 0 : index
    %c0_8 = arith.constant 0 : index
    %25 = vector.load %arg4[%c0_7, %c0_8] : memref<8x256xf32, #tpu.memory_space<vmem>>, vector<8x256xf32>
    tpu.vector_store %arg4[%c0_7, %c0_8], %24 {strides = array<i32>} : memref<8x256xf32, #tpu.memory_space<vmem>>, vector<8x256xf32>,
    %c0_9 = arith.constant 0 : index
    %c0_10 = arith.constant 0 : index
    %26 = vector.load %arg5[%c0_9, %c0_10] : memref<8x256xf32, #tpu.memory_space<vmem>>, vector<8x256xf32>
    %27 = arith.mulf %18, %18 : vector<8x256xf32>
    %28 = arith.addf %26, %27 : vector<8x256xf32>
    %c0_11 = arith.constant 0 : index
    %c0_12 = arith.constant 0 : index
    %29 = vector.load %arg5[%c0_11, %c0_12] : memref<8x256xf32, #tpu.memory_space<vmem>>, vector<8x256xf32>
    tpu.vector_store %arg5[%c0_11, %c0_12], %28 {strides = array<i32>} : memref<8x256xf32, #tpu.memory_space<vmem>>, vector<8x256xf32>,
    %c1_i32_13 = arith.constant 1 : i32
    %c0_i32_14 = arith.constant 0 : i32
    %30 = arith.cmpi eq, %arg1, %c0_i32_14 : i32
    %31 = arith.extui %30 : i1 to i32
    %c0_i32_15 = arith.constant 0 : i32
    %32 = arith.cmpi ne, %31, %c0_i32_15 : i32
    scf.if %32 {
      %c0_16 = arith.constant 0 : index
      %c0_17 = arith.constant 0 : index
      %33 = vector.load %arg4[%c0_16, %c0_17] : memref<8x256xf32, #tpu.memory_space<vmem>>, vector<8x256xf32>
      %34 = vector.shape_cast %33 : vector<8x256xf32> to vector<1x8x256xf32>
      %cst_18 = arith.constant dense<0.000000e+00> : vector<1xf32>
      %35 = vector.multi_reduction <add>, %34, %cst_18 [1, 2] : vector<1x8x256xf32> to vector<1xf32>
      %36 = vector.shape_cast %35 : vector<1xf32> to vector<1x1x1xf32>
      %37 = vector.extract %36[0, 0, 0] : f32 from vector<1x1x1xf32>
      %c0_19 = arith.constant 0 : index
      %c0_20 = arith.constant 0 : index
      %38 = memref.load %arg3[%c0_19, %c0_20] : memref<1x2xf32, #tpu.memory_space<smem>>
      memref.store %37, %arg3[%c0_19, %c0_20] : memref<1x2xf32, #tpu.memory_space<smem>>
      %c0_21 = arith.constant 0 : index
      %c0_22 = arith.constant 0 : index
      %39 = vector.load %arg5[%c0_21, %c0_22] : memref<8x256xf32, #tpu.memory_space<vmem>>, vector<8x256xf32>
      %40 = vector.shape_cast %39 : vector<8x256xf32> to vector<1x8x256xf32>
      %cst_23 = arith.constant dense<0.000000e+00> : vector<1xf32>
      %41 = vector.multi_reduction <add>, %40, %cst_23 [1, 2] : vector<1x8x256xf32> to vector<1xf32>
      %42 = vector.shape_cast %41 : vector<1xf32> to vector<1x1x1xf32>
      %43 = vector.extract %42[0, 0, 0] : f32 from vector<1x1x1xf32>
      %c0_24 = arith.constant 0 : index
      %c1 = arith.constant 1 : index
      %44 = memref.load %arg3[%c0_24, %c1] : memref<1x2xf32, #tpu.memory_space<smem>>
      memref.store %43, %arg3[%c0_24, %c1] : memref<1x2xf32, #tpu.memory_space<smem>>
    } else {
    }
    return
  }
  func.func @transform_0(%arg0: i32, %arg1: i32) -> (i32, i32) {
    %c1_i32 = arith.constant 1 : i32
    %0 = arith.muli %arg0, %c1_i32 : i32
    %1 = arith.addi %0, %arg1 : i32
    %c0_i32 = arith.constant 0 : i32
    %c0_i32_0 = arith.constant 0 : i32
    return %1, %c0_i32 : i32, i32
  }
  func.func @transform_1(%arg0: i32, %arg1: i32) -> (i32, i32) {
    %c0_i32 = arith.constant 0 : i32
    %c0_i32_0 = arith.constant 0 : i32
    return %arg0, %c0_i32 : i32, i32
  }
}

</mosaic_0001>

<bundles_post_ra>
// kernel: tpu_custom_call.1
= control target key start
LH: loop header
LB: loop body
LE: loop exit
PB: predicated region body
PF: predicated region fallthrough
CT: control target
= control target key end

     0   :  { %6 = vsyncpa [#allocation5], 0  ;;  %s213_s0 = inlined_call_operand.hbm [shape: f32[8,256], index: 0, kind: input, shape index: {}]   ;;  %s214_s1 = inlined_call_operand.hbm [shape: f32[1,2], index: 1, kind: output, shape index: {}]  }
   0x1   :  { %7 = vsyncpa [#allocation6], 0  ;;  %s175_s6 = smov [#allocation4]   ;;  %s139_s10 = scalar_lea.hbm %s213_s0, 256 }
   0x2   :  { %s18_s7 = sshll.u32 %s175_s6, 4  ;;  %p140_p0 = scmp.ne.s32.totalorder %s213_s0, %s139_s10  ;;  %s19_s7 = int_to_ptr.vmem [resolvable:$true] %s18_s7 }
   0x3   :  { %p143_p1 = scmp.lt.u32.totalorder %s139_s10, %s213_s0 }
   0x5   :  { %p145_p2 = pnand %p143_p1, %p140_p0 }
   0x7   :  { %148 = shalt.err (!%p145_p2)
}
   0x8   :  { %s149_s15 = scalar_lea.vmem %s19_s7, 256  ;;  %p154_p4 = scmp.lt.s32.totalorder %s19_s7, %s19_s7 }
   0x9   :  { %p150_p3 = scmp.ne.s32.totalorder %s19_s7, %s149_s15  ;;  %p155_p5 = scmp.lt.s32.totalorder %s149_s15, %s149_s15 }
   0xb   :  { %p156_p6 = por %p155_p5, %p154_p4 }
   0xd   :  { %p157_p7 = pnand %p156_p6, %p150_p3 }
   0xf   :  { %160 = shalt.err (!%p157_p7)
}
  0x10   :  { %21 = dma.hbm_to_vmem [thread:$0]  %s213_s0, 256, %s19_s7, [#allocation5]  }
  0x11   :  { %171 = dma.done.wait [#allocation5], 256  }
  0x12   :  { %172 = vsyncadd [#allocation5], 4294967040  ;;  %v46_v0 = vld [vmem:[#allocation4] sm:$0xff]  ;;  %s176_s18 = smov 16   ;;  %s177_s19 = smov 1   ;;  %v47_v1 = vld [vmem:[#allocation4 + $0x8] sm:$0xff]  ;;  %v34_v2 = vlaneseq }
  0x13   :  { %55 = vrot.lane.b32.xlu1 %v46_v0, %s176_s18  ;;  %48 = vrot.lane.b32.xlu0 %v46_v0, %s177_s19  ;;  %s161_s23 = scalar_lea.hbm %s214_s1, 16 }
  0x14   :  { %v35_v3 = vand.u32 127, %v34_v2  ;;  %p162_p8 = scmp.ne.s32.totalorder %s214_s1, %s161_s23  ;;  %p165_p9 = scmp.lt.u32.totalorder %s161_s23, %s214_s1 }
  0x16   :  { %v36_v4 = vadd.s32 128, %v35_v3  ;;  %v37_v7 = vand.u32 15, %v35_v3  ;;  %vm59_vm0 = vcmp.lt.s32.totalorder %v35_v3, 16  ;;  %vm52_vm1 = vcmp.lt.s32.totalorder %v35_v3, 1  ;;  %p167_p10 = pnand %p165_p9, %p162_p8 }
  0x17   :  { %57 = vrot.lane.b32.xlu1 %v47_v1, %s176_s18  ;;  %50 = vrot.lane.b32.xlu0 %v47_v1, %s177_s19  ;;  %vm41_vm2 = vcmp.ge.s32.totalorder %v35_v3, 16 }
  0x18   :  { %v38_v8 = vand.u32 15, %v36_v4  ;;  %vm39_vm3 = vcmp.ne.s32.totalorder %v37_v7, 0 }
  0x1a   :  { %vm40_vm4 = vcmp.ne.s32.totalorder %v38_v8, 0 }
  0x85   :  { %v56_v5 = vpop.permute.xlu1 %55  ;;  %v49_v6 = vpop.permute.xlu0 %48 }
  0x89   :  { %v58_v9 = vpop.permute.xlu1 %57  ;;  %v51_v10 = vpop.permute.xlu0 %50 }
  0x8a   :  { %v60_v11 = vsel %vm59_vm0, %v56_v5, %v58_v9  ;;  %v61_v12 = vsel %vm59_vm0, %v58_v9, %v56_v5  ;;  %v53_v13 = vsel %vm52_vm1, %v49_v6, %v51_v10  ;;  %v54_v14 = vsel %vm52_vm1, %v51_v10, %v49_v6 }
  0x8b   :  { %v66_v15 = vsub.f32 %v46_v0, %v61_v12  ;;  %v67_v16 = vsub.f32 %v47_v1, %v60_v11  ;;  %v62_v17 = vsub.f32 %v46_v0, %v54_v14  ;;  %v63_v18 = vsub.f32 %v47_v1, %v53_v13 }
  0x8d   :  { %v73_v19 = vmul.f32 %v67_v16, %v67_v16  ;;  %v68_v20 = vsel %vm41_vm2, %v66_v15, 0.0  ;;  %v64_v21 = vsel %vm39_vm3, %v62_v17, 0.0  ;;  %v65_v22 = vsel %vm40_vm4, %v63_v18, 0.0 }
  0x8e   :  { %v72_v23 = vmul.f32 %v68_v20, %v68_v20  ;;  %v80_v24 = vmul.f32 %v64_v21, %v64_v21  ;;  %v81_v25 = vmul.f32 %v65_v22, %v65_v22 }
  0x90   :  { %v91_v26 = vadd.f32 %v73_v19, %v72_v23  ;;  %v105_v27 = vadd.f32 %v81_v25, %v80_v24 }
  0x92   :  { %92 = vadd.xlane.f32.xlu0 %v91_v26  ;;  %106 = vadd.xlane.f32.xlu1 %v105_v27 }
 0x11f   :  { %v107_v28 = vpop.xlane.xlu1 %106  ;;  %v93_v29 = vpop.xlane.xlu0 %92 }
 0x120   :  { %v108_v30 = vrot.slane %v107_v28, 4  ;;  %v94_v31 = vrot.slane %v93_v29, 4 }
 0x122   :  { %v109_v32 = vadd.f32 %v108_v30, %v107_v28  ;;  %v95_v33 = vadd.f32 %v94_v31, %v93_v29 }
 0x124   :  { %v110_v34 = vrot.slane %v109_v32, 2  ;;  %v96_v35 = vrot.slane %v95_v33, 2 }
 0x126   :  { %v111_v36 = vadd.f32 %v110_v34, %v109_v32  ;;  %v97_v37 = vadd.f32 %v96_v35, %v95_v33 }
 0x128   :  { %v98_v38 = vrot.slane %v97_v37, 1  ;;  %v112_v39 = vrot.slane %v111_v36, 1 }
 0x12a   :  { %v99_v40 = vadd.f32 %v98_v38, %v97_v37  ;;  %v113_v41 = vadd.f32 %v112_v39, %v111_v36 }
 0x12c   :  { %131 = vpush %v99_v40 }
 0x12d   :  { %133 = vpush %v113_v41 }
 0x15d   :  { %s132_s0 = spop %131 }
 0x15e   :  { %102 = sst [smem:[#allocation7]] %s132_s0  ;;  %s134_s20 = spop %133 }
 0x15f   :  { %116 = sst [smem:[#allocation7 + $0x1]] %s134_s20 }
 0x160   :  { %170 = shalt.err (!%p167_p10)
}
 0x161   :  { %s178_s28 = smov [#allocation7]  }
 0x162   :  { %124 = dma.smem_to_hbm %s178_s28, 16, %s214_s1, [#allocation6]  }
 0x163   :  { %173 = dma.done.wait [#allocation6], 16  }
 0x164   :  { %174 = vsyncadd [#allocation6], 4294967280 }
 0x165   :  { %128 = sfence }
 0x166   :  { %129 = vsyncpa [#allocation5], 1 }
 0x167   :  { %130 = vsyncpa [#allocation6], 1 }

</bundles_post_ra>
